<compile_context>
chip_gen: v7x
topology: tpu7x:2x2x1
jax: 0.10.0
libtpu: 0.0.40
codegen_flags: <defaults>
</compile_context>

<pallas_src>
import jax
import jax.numpy as jnp
from jax.experimental import pallas as pl
from jax.experimental.pallas import tpu as pltpu


def _round_up(x, m):
    return ((x + m - 1) // m) * m


def _tile_rows(n_rows, lane_elems, budget_bytes=3 * 1024 * 1024):
    """Rows per output block: multiple of 8, ~budget_bytes of *padded* VMEM per
    block, and small enough that the grid has >= 2 steps (v7x: 2 TCs)."""
    if n_rows <= 8:
        return n_rows                                   # full-extent block is legal
    row_bytes = _round_up(lane_elems, 128) * 4          # lane padding for dim < 128
    t = max(8, (budget_bytes // row_bytes) // 8 * 8)
    half = _round_up((n_rows + 1) // 2, 8)              # guarantee >= 2 grid steps
    return max(8, min(t, half))


def _vmem_limit_bytes(tile_rows, lane_elems):
    block = _round_up(tile_rows, 8) * _round_up(lane_elems, 128) * 4
    # 2 outputs x 2 pipeline buffers + tiny inputs + headroom.
    return int(min(64 * 1024 * 1024,
                   max(16 * 1024 * 1024, 4 * block + 4 * 1024 * 1024)))


def _rotary_tables_flat(inv_freq, this_h, this_w):
    """cos/sin tables in flattened lane-dense layout, shape (H, W*dim)."""
    dh = int(inv_freq.shape[0])
    dim = 2 * dh
    lw = this_w * dim

    # Per-lane constants (lw floats each, computed once in the wrapper):
    #   A[c*dim + k] = inv_freq[k]          if k <  dh else 0   (row part)
    #   C[c*dim + k] = c * inv_freq[k - dh] if k >= dh else 0   (col part)
    zeros = jnp.zeros((dh,), jnp.float32)
    a = jnp.tile(jnp.concatenate([inv_freq, zeros]), this_w).reshape(1, lw)
    cols = jnp.repeat(jnp.arange(this_w, dtype=jnp.float32), dim)
    c = (cols * jnp.tile(jnp.concatenate([zeros, inv_freq]), this_w)).reshape(1, lw)

    th = _tile_rows(this_h, lw)
    grid = (pl.cdiv(this_h, th),)

    def kernel(a_ref, c_ref, cos_ref, sin_ref):
        i = pl.program_id(0)
        rows = i * th + jax.lax.broadcasted_iota(jnp.int32, (th, lw), 0)
        ang = rows.astype(jnp.float32) * a_ref[...] + c_ref[...]
        cos_ref[...] = jnp.cos(ang)
        sin_ref[...] = jnp.sin(ang)

    cos, sin = pl.pallas_call(
        kernel,
        out_shape=(jax.ShapeDtypeStruct((this_h, lw), jnp.float32),
                   jax.ShapeDtypeStruct((this_h, lw), jnp.float32)),
        grid=grid,
        in_specs=[pl.BlockSpec((1, lw), lambda i: (0, 0)),
                  pl.BlockSpec((1, lw), lambda i: (0, 0))],
        out_specs=(pl.BlockSpec((th, lw), lambda i: (i, 0)),
                   pl.BlockSpec((th, lw), lambda i: (i, 0))),
        compiler_params=pltpu.CompilerParams(
            dimension_semantics=("parallel",),
            vmem_limit_bytes=_vmem_limit_bytes(th, lw)),
    )(a, c)
    return cos, sin


def _rotary_tables_rows(inv_freq, this_h, this_w, ext):
    """Single-pass build of the final (ext + H*W, dim) tables with the register
    rows (cos=1, sin=0) written inside the kernel -> no extra HBM copy pass."""
    dh = int(inv_freq.shape[0])
    dim = 2 * dh
    s_total = ext + this_h * this_w

    zeros = jnp.zeros((dh,), jnp.float32)
    fh = jnp.concatenate([inv_freq, zeros]).reshape(1, dim)    # row-freq lanes
    fw = jnp.concatenate([zeros, inv_freq]).reshape(1, dim)    # col-freq lanes

    tb = _tile_rows(s_total, dim)
    grid = (pl.cdiv(s_total, tb),)
    w = float(this_w)

    def kernel(fh_ref, fw_ref, cos_ref, sin_ref):
        i = pl.program_id(0)
        s = i * tb + jax.lax.broadcasted_iota(jnp.int32, (tb, dim), 0)
        q = jnp.maximum(s - ext, 0).astype(jnp.float32)
        # q // w and q % w in f32; +0.5 keeps floor robust to division rounding
        # (exact for tables with < 2**24 rows and h, w <= ~2048).
        h_row = jnp.floor((q + 0.5) / w)
        w_col = q - h_row * w
        ang = h_row * fh_ref[...] + w_col * fw_ref[...]
        is_reg = s < ext
        cos_ref[...] = jnp.where(is_reg, 1.0, jnp.cos(ang))
        sin_ref[...] = jnp.where(is_reg, 0.0, jnp.sin(ang))

    cos, sin = pl.pallas_call(
        kernel,
        out_shape=(jax.ShapeDtypeStruct((s_total, dim), jnp.float32),
                   jax.ShapeDtypeStruct((s_total, dim), jnp.float32)),
        grid=grid,
        in_specs=[pl.BlockSpec((1, dim), lambda i: (0, 0)),
                  pl.BlockSpec((1, dim), lambda i: (0, 0))],
        out_specs=(pl.BlockSpec((tb, dim), lambda i: (i, 0)),
                   pl.BlockSpec((tb, dim), lambda i: (i, 0))),
        compiler_params=pltpu.CompilerParams(
            dimension_semantics=("parallel",),
            vmem_limit_bytes=_vmem_limit_bytes(tb, dim)),
    )(fh, fw)
    return cos, sin


class TwoDimRotaryPallas:
    """JAX/Pallas port of TwoDimRotary. Tables are built on demand for the
    requested (this_h, this_w); values match the PyTorch buffer slices."""

    def __init__(self, dim, base=10000, h=256, w=256):
        self.dim = dim
        self.h = h
        self.w = w
        i = jnp.arange(0, dim, 2, dtype=jnp.float32)
        self.inv_freq = (1.0 / (base ** (i / dim))).astype(jnp.float32)

    def __call__(self, x, height_width=None, extend_with_register_tokens=0):
        if height_width is not None:
            this_h, this_w = height_width
        else:
            # Matches PyTorch: non-square sequence lengths truncate via int(sqrt).
            this_hw = x.shape[1]
            this_h = this_w = int(this_hw ** 0.5)
        this_h, this_w = int(this_h), int(this_w)
        ext = int(extend_with_register_tokens)
        table_dim = 2 * int(self.inv_freq.shape[0])

        if ext > 0:
            # Register rows are written inside the kernel (single HBM pass).
            cos, sin = _rotary_tables_rows(self.inv_freq, this_h, this_w, ext)
        else:
            # Lane-dense layout; reshape to (H*W, dim) is a contiguous no-op.
            cos, sin = _rotary_tables_flat(self.inv_freq, this_h, this_w)
            cos = cos.reshape(this_h * this_w, table_dim)
            sin = sin.reshape(this_h * this_w, table_dim)
        # TODO(synk): emit bf16 tables if the downstream rotary application runs
        # in bf16 (halves HBM writeback on this bandwidth-bound table build).
        return cos[None, None, :, :], sin[None, None, :, :]


def _reference(inv_freq, this_h, this_w, ext):
    """Pure-JAX reference mirroring the PyTorch buffer construction."""
    t_h = jnp.arange(this_h, dtype=jnp.float32)
    t_w = jnp.arange(this_w, dtype=jnp.float32)
    freqs_h = jnp.einsum("i,j->ij", t_h, inv_freq)[:, None, :]
    freqs_w = jnp.einsum("i,j->ij", t_w, inv_freq)[None, :, :]
    freqs_h = jnp.tile(freqs_h, (1, this_w, 1))
    freqs_w = jnp.tile(freqs_w, (this_h, 1, 1))
    freqs_hw = jnp.concatenate([freqs_h, freqs_w], axis=2)
    cos = jnp.cos(freqs_hw).reshape(this_h * this_w, -1)
    sin = jnp.sin(freqs_hw).reshape(this_h * this_w, -1)
    if ext > 0:
        cos = jnp.concatenate([jnp.ones((ext, cos.shape[1]), jnp.float32), cos], 0)
        sin = jnp.concatenate([jnp.zeros((ext, sin.shape[1]), jnp.float32), sin], 0)
    return cos[None, None], sin[None, None]


if __name__ == "__main__":
    key = jax.random.PRNGKey(0)
    dim = 32
    batch, seq = 2, 64          # seq = 8 * 8  -> this_h = this_w = 8
    x = jax.random.normal(key, (batch, seq, dim), dtype=jnp.float32)

    rope = TwoDimRotaryPallas(dim=dim, base=10000, h=256, w=256)

    # default path (h, w inferred from x.shape[1]); lane-dense kernel
    cos0, sin0 = rope(x)
    cos0, sin0 = jax.block_until_ready(cos0), jax.block_until_ready(sin0)

    # explicit height_width + register tokens; single-pass row kernel
    cos1, sin1 = rope(x, height_width=(8, 8), extend_with_register_tokens=4)
    cos1, sin1 = jax.block_until_ready(cos1), jax.block_until_ready(sin1)

    # correctness check against a pure-JAX reference of the PyTorch math
    rcos0, rsin0 = _reference(rope.inv_freq, 8, 8, 0)
    rcos1, rsin1 = _reference(rope.inv_freq, 8, 8, 4)
    assert cos0.shape == (1, 1, 64, dim) and sin0.shape == (1, 1, 64, dim)
    assert cos1.shape == (1, 1, 68, dim) and sin1.shape == (1, 1, 68, dim)
    assert jnp.max(jnp.abs(cos0 - rcos0)) < 1e-5
    assert jnp.max(jnp.abs(sin0 - rsin0)) < 1e-5
    assert jnp.max(jnp.abs(cos1 - rcos1)) < 1e-5
    assert jnp.max(jnp.abs(sin1 - rsin1)) < 1e-5

    print("KERNEL_OK")
</pallas_src>

<mosaic_0001>
module attributes {stable_mosaic.version = 11 : i64} {
  func.func @kernel(%arg0: i32, %arg1: memref<1x256xf32, #tpu.memory_space<vmem>>, %arg2: memref<1x256xf32, #tpu.memory_space<vmem>>, %arg3: memref<8x256xf32, #tpu.memory_space<vmem>>, %arg4: memref<8x256xf32, #tpu.memory_space<vmem>>) attributes {dimension_semantics = [#tpu.dimension_semantics<parallel>], iteration_bounds = array<i64: 1>, scalar_prefetch = 0 : i64, scratch_operands = 0 : i64, tpu.core_type = #tpu.core_type<tc>, window_params = [{pipeline_mode = #tpu.pipeline_mode<synchronous>, transform_indices = @transform_0, window_bounds = array<i64: 1, 256>}, {pipeline_mode = #tpu.pipeline_mode<synchronous>, transform_indices = @transform_1, window_bounds = array<i64: 1, 256>}, {transform_indices = @transform_2, window_bounds = array<i64: 8, 256>}, {transform_indices = @transform_3, window_bounds = array<i64: 8, 256>}]} {
    %c8_i32 = arith.constant 8 : i32
    %0 = arith.muli %arg0, %c8_i32 : i32
    %1 = tpu.iota {dimensions = array<i32: 0>} : vector<8x256xi32>
    %2 = vector.broadcast %0 : i32 to vector<8x256xi32>
    %3 = arith.addi %2, %1 : vector<8x256xi32>
    %4 = arith.sitofp %3 : vector<8x256xi32> to vector<8x256xf32>
    %c0 = arith.constant 0 : index
    %c0_0 = arith.constant 0 : index
    %5 = vector.load %arg1[%c0, %c0_0] : memref<1x256xf32, #tpu.memory_space<vmem>>, vector<1x256xf32>
    %6 = vector.broadcast %5 : vector<1x256xf32> to vector<8x256xf32>
    %7 = arith.mulf %4, %6 : vector<8x256xf32>
    %c0_1 = arith.constant 0 : index
    %c0_2 = arith.constant 0 : index
    %8 = vector.load %arg2[%c0_1, %c0_2] : memref<1x256xf32, #tpu.memory_space<vmem>>, vector<1x256xf32>
    %9 = vector.broadcast %8 : vector<1x256xf32> to vector<8x256xf32>
    %10 = arith.addf %7, %9 : vector<8x256xf32>
    %11 = math.cos %10 : vector<8x256xf32>
    %c0_3 = arith.constant 0 : index
    %c0_4 = arith.constant 0 : index
    %12 = vector.load %arg3[%c0_3, %c0_4] : memref<8x256xf32, #tpu.memory_space<vmem>>, vector<8x256xf32>
    tpu.vector_store %arg3[%c0_3, %c0_4], %11 {strides = array<i32>} : memref<8x256xf32, #tpu.memory_space<vmem>>, vector<8x256xf32>,
    %13 = math.sin %10 : vector<8x256xf32>
    %c0_5 = arith.constant 0 : index
    %c0_6 = arith.constant 0 : index
    %14 = vector.load %arg4[%c0_5, %c0_6] : memref<8x256xf32, #tpu.memory_space<vmem>>, vector<8x256xf32>
    tpu.vector_store %arg4[%c0_5, %c0_6], %13 {strides = array<i32>} : memref<8x256xf32, #tpu.memory_space<vmem>>, vector<8x256xf32>,
    return
  }
  func.func @transform_0(%arg0: i32) -> (i32, i32) {
    %c0_i32 = arith.constant 0 : i32
    %c0_i32_0 = arith.constant 0 : i32
    %c0_i32_1 = arith.constant 0 : i32
    return %c0_i32, %c0_i32_0 : i32, i32
  }
  func.func @transform_1(%arg0: i32) -> (i32, i32) {
    %c0_i32 = arith.constant 0 : i32
    %c0_i32_0 = arith.constant 0 : i32
    %c0_i32_1 = arith.constant 0 : i32
    return %c0_i32, %c0_i32_0 : i32, i32
  }
  func.func @transform_2(%arg0: i32) -> (i32, i32) {
    %c0_i32 = arith.constant 0 : i32
    %c0_i32_0 = arith.constant 0 : i32
    return %arg0, %c0_i32 : i32, i32
  }
  func.func @transform_3(%arg0: i32) -> (i32, i32) {
    %c0_i32 = arith.constant 0 : i32
    %c0_i32_0 = arith.constant 0 : i32
    return %arg0, %c0_i32 : i32, i32
  }
}

</mosaic_0001>

<bundles_post_ra>
// kernel: tpu_custom_call.1
= control target key start
LH: loop header
LB: loop body
LE: loop exit
PB: predicated region body
PF: predicated region fallthrough
CT: control target
= control target key end

     0   :  { %9 = vsyncpa [#allocation3], 0  ;;  %s759_s0 = inlined_call_operand.hbm [shape: f32[1,256], index: 0, kind: input, shape index: {}]   ;;  %s760_s1 = inlined_call_operand.vmem [shape: f32[1,256], index: 1, kind: input, shape index: {}]   ;;  %s761_s2 = inlined_call_operand.hbm [shape: f32[8,256], index: 2, kind: output, shape index: {0}]   ;;  %s762_s3 = inlined_call_operand.hbm [shape: f32[8,256], index: 3, kind: output, shape index: {1}]  }
   0x1   :  { %10 = vsyncpa [#allocation4], 0 }
   0x2   :  { %11 = vsyncpa [#allocation7], 0  ;;  %s621_s12 = smov [#allocation2]   ;;  %s549_s16 = scalar_lea.hbm %s759_s0, 32 }
   0x3   :  { %s18_s13 = sshll.u32 %s621_s12, 4  ;;  %p550_p0 = scmp.ne.s32.totalorder %s759_s0, %s549_s16  ;;  %s19_s13 = int_to_ptr.vmem [resolvable:$true] %s18_s13 }
   0x4   :  { %p553_p1 = scmp.lt.u32.totalorder %s549_s16, %s759_s0 }
   0x6   :  { %p555_p2 = pnand %p553_p1, %p550_p0 }
   0x8   :  { %558 = shalt.err (!%p555_p2)
}
   0x9   :  { %s559_s21 = scalar_lea.vmem %s19_s13, 32  ;;  %p564_p4 = scmp.lt.s32.totalorder %s19_s13, %s19_s13 }
   0xa   :  { %p560_p3 = scmp.ne.s32.totalorder %s19_s13, %s559_s21  ;;  %p565_p5 = scmp.lt.s32.totalorder %s559_s21, %s559_s21 }
   0xc   :  { %p566_p6 = por %p565_p5, %p564_p4 }
   0xe   :  { %p567_p7 = pnand %p566_p6, %p560_p3 }
  0x10   :  { %570 = shalt.err (!%p567_p7)
}
  0x11   :  { %21 = dma.hbm_to_vmem [thread:$0]  %s759_s0, 32, %s19_s13, [#allocation3]  }
  0x12   :  { %615 = dma.done.wait [#allocation3], 32  }
  0x13   :  { %616 = vsyncadd [#allocation3], 4294967264  ;;  %v28_v0 = vlaneseq  ;;  %v33_v5 = vld [vmem:[#allocation2] sm:$0x3]  ;;  %v622_v37 = vmov 683565275  }
  0x14   :  { %v47_v6 = vld [vmem:[%s760_s1] sm:$0x3]  ;;  %v623_v39 = vmov 2475754826   ;;  %v624_v41 = vmov 2131351028  }
  0x15   :  { %v29_v1 = vshrl.u32 %v28_v0, 7  ;;  %v625_v43 = vmov 2102212464   ;;  %v626_v45 = vmov 920167782   ;;  %s628_s0 = smov [#allocation5]  }
  0x16   :  { %v627_v53 = vmov 1326507024   ;;  %s485_s1 = sshll.u32 %s628_s0, 4  ;;  %s629_s26 = smov [#allocation6]   ;;  %s486_s1 = int_to_ptr.vmem [resolvable:$true] %s485_s1 }
  0x17   :  { %v37_v2 = vsub.s32 0, %v29_v1  ;;  %v41_v3 = vsub.s32 1, %v29_v1  ;;  %v32_v4 = vcvt.s32.f32 %v29_v1  ;;  %s495_s27 = sshll.u32 %s629_s26, 4  ;;  %s571_s28 = scalar_lea.vmem %s486_s1, 256  ;;  %s496_s27 = int_to_ptr.vmem [resolvable:$true] %s495_s27 }
  0x18   :  { %p572_p8 = scmp.ne.s32.totalorder %s486_s1, %s571_s28  ;;  %p576_p9 = scmp.lt.s32.totalorder %s486_s1, %s486_s1 }
  0x19   :  { %v38_v7 = vrot.slane %v33_v5, %v37_v2  ;;  %v52_v8 = vrot.slane %v47_v6, %v37_v2  ;;  %v42_v9 = vrot.slane %v33_v5, %v41_v3  ;;  %v56_v10 = vrot.slane %v47_v6, %v41_v3  ;;  %p577_p10 = scmp.lt.s32.totalorder %s571_s28, %s571_s28 }
  0x1b   :  { %v45_v11 = vmul.f32 %v38_v7, %v32_v4  ;;  %v46_v12 = vmul.f32 %v42_v9, %v32_v4  ;;  %p578_p11 = por %p577_p10, %p576_p9 }
  0x1d   :  { %v665_v13 = vadd.f32 %v52_v8, %v45_v11  ;;  %v667_v14 = vadd.f32 %v56_v10, %v46_v12  ;;  %p579_p12 = pnand %p578_p11, %p572_p8 }
  0x1f   :  { %v61_v15 = vand.u32 2147483647, %v665_v13  ;;  %v64_v16 = vand.u32 2139095040, %v665_v13  ;;  %v164_v17 = vand.u32 2147483647, %v667_v14  ;;  %v167_v18 = vand.u32 2139095040, %v667_v14 }
  0x20   :  { %vm63_vm14 = vcmp.lt.s32.totalorder %v665_v13, 0 }
  0x21   :  { %v65_v19 = vshrl.u32 %v64_v16, 23  ;;  %v68_v20 = vand.u32 8388607, %v61_v15  ;;  %v168_v21 = vshrl.u32 %v167_v18, 23  ;;  %v171_v22 = vand.u32 8388607, %v164_v17 }
  0x22   :  { %vm62_vm15 = vcmp.le.f32.partialorder %v61_v15, 0.7853982 }
  0x23   :  { %v508_v23 = vadd.s32 4294967169, %v65_v19  ;;  %v512_v24 = vadd.s32 4294967169, %v168_v21  ;;  %v69_v26 = vor.u32 8388608, %v68_v20  ;;  %v172_v27 = vor.u32 8388608, %v171_v22 }
  0x25   :  { %v71_v25 = vadd.s32 1, %v508_v23  ;;  %v174_v28 = vadd.s32 1, %v512_v24  ;;  %v677_v33 = vshll.u32 %v69_v26, 8  ;;  %v679_v35 = vshll.u32 %v172_v27, 8 }
  0x27   :  { %vm72_vm0 = vcmp.gt.s32.totalorder %v71_v25, 0  ;;  %vm175_vm1 = vcmp.gt.s32.totalorder %v174_v28, 0 }
  0x28   :  { %v73_v29 = vsel %vm72_vm0, %v71_v25, 0  ;;  %v176_v32 = vsel %vm175_vm1, %v174_v28, 0  ;;  %vm166_vm0 = vcmp.lt.s32.totalorder %v667_v14, 0  ;;  %vm165_vm1 = vcmp.le.f32.partialorder %v164_v17, 0.7853982 }
  0x29   :  { %v74_v30 = vshrl.u32 %v73_v29, 5  ;;  %v75_v31 = vand.u32 31, %v73_v29  ;;  %v178_v34 = vand.u32 31, %v176_v32  ;;  %v681_v47 = vshrl.u32 %v176_v32, 5 }
  0x2b   :  { %v76_v36 = vsub.s32 32, %v75_v31  ;;  %v78_v38 = vshll.u32 %v622_v37, %v75_v31  ;;  %v81_v40 = vshll.u32 %v623_v39, %v75_v31  ;;  %v84_v42 = vshll.u32 %v624_v41, %v75_v31 }
  0x2c   :  { %v87_v44 = vshll.u32 %v625_v43, %v75_v31  ;;  %v90_v46 = vshll.u32 %v626_v45, %v75_v31  ;;  %vm93_vm2 = vcmp.lt.s32.totalorder %v74_v30, 1  ;;  %vm94_vm3 = vcmp.lt.s32.totalorder %v74_v30, 2 }
  0x2d   :  { %v77_v48 = vshrl.u32 %v622_v37, %v76_v36  ;;  %v79_v49 = vshrl.u32 %v623_v39, %v76_v36  ;;  %v82_v50 = vshrl.u32 %v624_v41, %v76_v36  ;;  %v85_v51 = vshrl.u32 %v625_v43, %v76_v36 }
  0x2e   :  { %v88_v52 = vshrl.u32 %v626_v45, %v76_v36  ;;  %v91_v54 = vshrl.u32 %v627_v53, %v76_v36  ;;  %vm96_vm4 = vcmp.lt.s32.totalorder %v74_v30, 4  ;;  %v179_v58 = vsub.s32 32, %v178_v34 }
  0x2f   :  { %v80_v55 = vor.u32 %v79_v49, %v78_v38  ;;  %v83_v56 = vor.u32 %v82_v50, %v81_v40  ;;  %v86_v57 = vor.u32 %v85_v51, %v84_v42  ;;  %vm95_vm5 = vcmp.lt.s32.totalorder %v74_v30, 3 }
  0x30   :  { %v89_v59 = vor.u32 %v88_v52, %v87_v44  ;;  %v92_v60 = vor.u32 %v91_v54, %v90_v46  ;;  %v181_v61 = vshll.u32 %v622_v37, %v178_v34  ;;  %v184_v5 = vshll.u32 %v623_v39, %v178_v34 }
  0x31   :  { %v97_v62 = vsel %vm93_vm2, %v77_v48, %v80_v55  ;;  %v98_v63 = vsel %vm96_vm4, %v86_v57, 2102212464  ;;  %v101_v0 = vsel %vm93_vm2, %v80_v55, %v83_v56  ;;  %v105_v1 = vsel %vm93_vm2, %v83_v56, %v86_v57 }
  0x32   :  { %v99_v2 = vsel %vm95_vm5, %v83_v56, %v98_v63  ;;  %v102_v3 = vsel %vm96_vm4, %v89_v59, 920167782  ;;  %v106_v4 = vsel %vm96_vm4, %v92_v60, 1326507024  ;;  %v180_v8 = vshrl.u32 %v622_v37, %v179_v58 }
  0x33   :  { %v103_v6 = vsel %vm95_vm5, %v86_v57, %v102_v3  ;;  %v107_v7 = vsel %vm95_vm5, %v89_v59, %v106_v4  ;;  %v182_v9 = vshrl.u32 %v623_v39, %v179_v58  ;;  %v100_v10 = vsel %vm94_vm3, %v97_v62, %v99_v2 }
  0x34   :  { %v104_v11 = vsel %vm94_vm3, %v101_v0, %v103_v6  ;;  %v108_v12 = vsel %vm94_vm3, %v105_v1, %v107_v7  ;;  %v185_v16 = vshrl.u32 %v624_v41, %v179_v58  ;;  %v187_v24 = vshll.u32 %v624_v41, %v178_v34 }
  0x35   :  { %v690_v18 = vmul.u32.u64.low %v677_v33, %v108_v12  ;;  %v691_v19 = vmul.u32.u64.high %v677_v33, %v108_v12, %v690_v18  ;;  %v694_v20 = vmul.u32.u64.low %v677_v33, %v104_v11  ;;  %v695_v21 = vmul.u32.u64.high %v677_v33, %v104_v11, %v694_v20 }
  0x36   :  { %v183_v22 = vor.u32 %v182_v9, %v181_v61  ;;  %v186_v23 = vor.u32 %v185_v16, %v184_v5  ;;  %v188_v25 = vshrl.u32 %v625_v43, %v179_v58  ;;  %v190_v26 = vshll.u32 %v625_v43, %v178_v34 }
  0x37   :  { %v191_v27 = vshrl.u32 %v626_v45, %v179_v58  ;;  %v193_v28 = vshll.u32 %v626_v45, %v178_v34  ;;  %v194_v29 = vshrl.u32 %v627_v53, %v179_v58  ;;  %v116_v30 = vmul.u32 %v677_v33, %v100_v10 }
  0x38   :  { %v189_v31 = vor.u32 %v188_v25, %v187_v24  ;;  %vm196_vm6 = vcmp.lt.s32.totalorder %v681_v47, 1  ;;  %vm197_vm7 = vcmp.lt.s32.totalorder %v681_v47, 2  ;;  %vm118_vm8 = vc.u32 %v691_v19, %v694_v20 }
  0x39   :  { %v119_v32 = vadd.s32 1, %v695_v21  ;;  %v192_v36 = vor.u32 %v191_v27, %v190_v26  ;;  %vm198_vm9 = vcmp.lt.s32.totalorder %v681_v47, 3  ;;  %v195_v37 = vor.u32 %v194_v29, %v193_v28 }
  0x3a   :  { %vm199_vm10 = vcmp.lt.s32.totalorder %v681_v47, 4  ;;  %v200_v38 = vsel %vm196_vm6, %v180_v8, %v183_v22  ;;  %v204_v34 = vsel %vm196_vm6, %v183_v22, %v186_v23  ;;  %v208_v41 = vsel %vm196_vm6, %v186_v23, %v189_v31 }
  0x3b   :  { %v120_v39 = vsel %vm118_vm8, %v119_v32, %v695_v21  ;;  %v201_v33 = vsel %vm199_vm10, %v189_v31, 2102212464  ;;  %v205_v40 = vsel %vm199_vm10, %v192_v36, 920167782  ;;  %v209_v45 = vsel %vm199_vm10, %v195_v37, 1326507024 }
  0x3c   :  { %v121_v42 = vadd.s32 %v120_v39, %v116_v30  ;;  %v202_v43 = vsel %vm198_vm9, %v186_v23, %v201_v33  ;;  %v206_v44 = vsel %vm198_vm9, %v189_v31, %v205_v40  ;;  %v210_v49 = vsel %vm198_vm9, %v192_v36, %v209_v45 }
  0x3d   :  { %v203_v46 = vsel %vm197_vm7, %v200_v38, %v202_v43  ;;  %v207_v48 = vsel %vm197_vm7, %v204_v34, %v206_v44  ;;  %v211_v51 = vsel %vm197_vm7, %v208_v41, %v210_v49  ;;  %v117_v6 = vadd.s32 %v694_v20, %v691_v19 }
  0x3e   :  { %v122_v50 = vadd.s32 536870912, %v121_v42  ;;  %v712_v52 = vmul.u32.u64.low %v679_v35, %v207_v48  ;;  %v713_v53 = vmul.u32.u64.high %v679_v35, %v207_v48, %v712_v52  ;;  %v219_v57 = vmul.u32 %v679_v35, %v203_v46 }
  0x3f   :  { %v716_v54 = vmul.u32.u64.low %v679_v35, %v211_v51  ;;  %v717_v55 = vmul.u32.u64.high %v679_v35, %v211_v51, %v716_v54  ;;  %vm153_vm8 = vweird.f32 %v665_v13 }
  0x40   :  { %v123_v56 = vshrl.u32 %v122_v50, 30  ;;  %v222_v59 = vadd.s32 1, %v713_v53 }
  0x41   :  { %vm221_vm11 = vc.u32 %v717_v55, %v712_v52  ;;  %v220_v26 = vadd.s32 %v712_v52, %v717_v55 }
  0x42   :  { %v124_v58 = vshll.u32 %v123_v56, 30  ;;  %v223_v47 = vsel %vm221_vm11, %v222_v59, %v713_v53  ;;  %v147_v19 = vsub.s32 4, %v123_v56 }
  0x43   :  { %v224_v61 = vadd.s32 %v223_v47, %v219_v57 }
  0x44   :  { %v125_v60 = vsub.s32 %v121_v42, %v124_v58  ;;  %v148_v38 = vsel %vm63_vm14, %v147_v19, %v123_v56 }
  0x45   :  { %v225_v63 = vadd.s32 536870912, %v224_v61  ;;  %v150_v41 = vsel %vm62_vm15, 0, %v148_v38 }
  0x46   :  { %v127_v62 = vsub.s32 0, %v125_v60  ;;  %v362_v46 = vadd.s32 3, %v150_v41  ;;  %v154_v50 = vand.u32 3, %v150_v41 }
  0x47   :  { %v226_v1 = vshrl.u32 %v225_v63, 30 }
  0x48   :  { %v509_v0 = vmin.u32 %v127_v62, %v125_v60  ;;  %v363_v51 = vand.u32 3, %v362_v46  ;;  %vm159_vm2 = vcmp.eq.s32.totalorder %v154_v50, 2  ;;  %vm156_vm4 = vcmp.eq.s32.totalorder %v154_v50, 0 }
  0x49   :  { %v227_v3 = vshll.u32 %v226_v1, 30  ;;  %v250_v45 = vsub.s32 4, %v226_v1  ;;  %vm155_vm6 = vcmp.lt.s32.totalorder %v154_v50, 2 }
  0x4a   :  { %v129_v2 = vclz %v509_v0  ;;  %vm368_vm3 = vcmp.eq.s32.totalorder %v363_v51, 2  ;;  %vm365_vm5 = vcmp.eq.s32.totalorder %v363_v51, 0  ;;  %vm364_vm7 = vcmp.lt.s32.totalorder %v363_v51, 2 }
  0x4b   :  { %v228_v5 = vsub.s32 %v224_v61, %v227_v3  ;;  %v251_v49 = vsel %vm166_vm0, %v250_v45, %v226_v1 }
  0x4c   :  { %v510_v4 = vadd.s32 4294967294, %v129_v2  ;;  %v253_v54 = vsel %vm165_vm1, 0, %v251_v49 }
  0x4d   :  { %v230_v7 = vsub.s32 0, %v228_v5  ;;  %v466_v58 = vadd.s32 3, %v253_v54  ;;  %v257_v63 = vand.u32 3, %v253_v54 }
  0x4e   :  { %vm511_vm12 = vcmp.lt.s32.totalorder %v510_v4, 0 }
  0x4f   :  { %v132_v35 = vsel %vm511_vm12, 0, %v510_v4  ;;  %v513_v11 = vmin.u32 %v230_v7, %v228_v5  ;;  %v467_v1 = vand.u32 3, %v466_v58  ;;  %vm262_vm9 = vcmp.eq.s32.totalorder %v257_v63, 2 }
  0x50   :  { %v133_v8 = vsub.s32 32, %v132_v35  ;;  %v134_v9 = vshll.u32 %v125_v60, %v132_v35  ;;  %v137_v10 = vsub.s32 4294967266, %v132_v35  ;;  %vm259_vm11 = vcmp.eq.s32.totalorder %v257_v63, 0 }
  0x51   :  { %v232_v18 = vclz %v513_v11  ;;  %vm472_vm10 = vcmp.eq.s32.totalorder %v467_v1, 2  ;;  %vm469_vm12 = vcmp.eq.s32.totalorder %v467_v1, 0 }
  0x52   :  { %v135_v12 = vshrl.u32 %v117_v6, %v133_v8  ;;  %v138_v16 = vadd.s32 127, %v137_v10 }
  0x53   :  { %v514_v23 = vadd.s32 4294967294, %v232_v18 }
  0x54   :  { %v136_v21 = vor.u32 %v135_v12, %v134_v9  ;;  %v139_v22 = vshll.u32 %v138_v16, 23 }
  0x55   :  { %vm515_vm13 = vcmp.lt.s32.totalorder %v514_v23, 0 }
  0x56   :  { %v140_v24 = vor.u32 4788187, %v139_v22  ;;  %v143_v25 = vcvt.s32.f32 %v136_v21  ;;  %v235_v20 = vsel %vm515_vm13, 0, %v514_v23  ;;  %vm258_vm13 = vcmp.lt.s32.totalorder %v257_v63, 2 }
  0x57   :  { %v236_v28 = vsub.s32 32, %v235_v20  ;;  %v237_v29 = vshll.u32 %v228_v5, %v235_v20  ;;  %v240_v30 = vsub.s32 4294967266, %v235_v20 }
  0x58   :  { %v141_v27 = vand.u32 2147483647, %v140_v24 }
  0x59   :  { %v238_v32 = vshrl.u32 %v220_v26, %v236_v28  ;;  %v241_v36 = vadd.s32 127, %v240_v30 }
  0x5a   :  { %v144_v31 = vmul.f32 %v143_v25, %v141_v27 }
  0x5b   :  { %v239_v34 = vor.u32 %v238_v32, %v237_v29  ;;  %v242_v39 = vshll.u32 %v241_v36, 23 }
  0x5c   :  { %v145_v37 = vxor.u32 2147483648, %v144_v31 }
  0x5d   :  { %v243_v42 = vor.u32 4788187, %v242_v39  ;;  %v246_v43 = vcvt.s32.f32 %v239_v34 }
  0x5e   :  { %v146_v33 = vsel %vm63_vm14, %v145_v37, %v144_v31  ;;  %vm468_vm14 = vcmp.lt.s32.totalorder %v467_v1, 2 }
  0x5f   :  { %v149_v40 = vsel %vm62_vm15, %v665_v13, %v146_v33  ;;  %v244_v44 = vand.u32 2147483647, %v243_v42  ;;  %vm256_vm15 = vweird.f32 %v667_v14 }
  0x60   :  { %541 = vcosq.f32 %v149_v40 }
  0x61   :  { %543 = vsinq.f32 %v149_v40  ;;  %v247_v48 = vmul.f32 %v246_v43, %v244_v44 }
  0x63   :  { %v248_v15 = vxor.u32 2147483648, %v247_v48 }
  0x65   :  { %v249_v52 = vsel %vm166_vm0, %v248_v15, %v247_v48 }
  0x66   :  { %v252_v53 = vsel %vm165_vm1, %v667_v14, %v249_v52 }
  0x67   :  { %545 = vcosq.f32 %v252_v53 }
  0x68   :  { %547 = vsinq.f32 %v252_v53 }
  0x6a   :  { %v542_v55 = vpop.eup %541 }
  0x6b   :  { %v544_v56 = vpop.eup %543  ;;  %v160_v57 = vxor.u32 2147483648, %v542_v55 }
  0x6c   :  { %v157_v17 = vxor.u32 2147483648, %v544_v56 }
  0x6d   :  { %v161_v59 = vsel %vm159_vm2, %v160_v57, %v544_v56  ;;  %v370_v60 = vsel %vm368_vm3, %v160_v57, %v544_v56 }
  0x6e   :  { %v158_v47 = vsel %vm156_vm4, %v542_v55, %v157_v17  ;;  %v367_v61 = vsel %vm365_vm5, %v542_v55, %v157_v17 }
  0x6f   :  { %v162_v62 = vsel %vm155_vm6, %v158_v47, %v161_v59  ;;  %v371_v0 = vsel %vm364_vm7, %v367_v61, %v370_v60 }
  0x70   :  { %v163_v2 = vsel %vm153_vm8, nan, %v162_v62  ;;  %v372_v3 = vsel %vm153_vm8, nan, %v371_v0 }
  0x71   :  { %267 = vst [vmem:[#allocation5] sm:$0xff] %v163_v2  ;;  %477 = vst [vmem:[#allocation6] sm:$0xff] %v372_v3  ;;  %v546_v4 = vpop.eup %545 }
  0x72   :  { %v548_v5 = vpop.eup %547  ;;  %v263_v6 = vxor.u32 2147483648, %v546_v4 }
  0x73   :  { %v260_v13 = vxor.u32 2147483648, %v548_v5 }
  0x74   :  { %v264_v35 = vsel %vm262_vm9, %v263_v6, %v548_v5  ;;  %v474_v7 = vsel %vm472_vm10, %v263_v6, %v548_v5 }
  0x75   :  { %v261_v8 = vsel %vm259_vm11, %v546_v4, %v260_v13  ;;  %v471_v9 = vsel %vm469_vm12, %v546_v4, %v260_v13 }
  0x76   :  { %v265_v10 = vsel %vm258_vm13, %v261_v8, %v264_v35  ;;  %v475_v11 = vsel %vm468_vm14, %v471_v9, %v474_v7 }
  0x77   :  { %v266_v12 = vsel %vm256_vm15, nan, %v265_v10  ;;  %v476_v16 = vsel %vm256_vm15, nan, %v475_v11 }
  0x78   :  { %268 = vst [vmem:[#allocation5 + $0x8] sm:$0xff] %v266_v12  ;;  %478 = vst [vmem:[#allocation6 + $0x8] sm:$0xff] %v476_v16 }
  0x79   :  { %582 = shalt.err (!%p579_p12)
}
  0x7a   :  { %s583_s4 = scalar_lea.hbm %s761_s2, 256 }
  0x7b   :  { %p584_p13 = scmp.ne.s32.totalorder %s761_s2, %s583_s4  ;;  %p587_p0 = scmp.lt.u32.totalorder %s583_s4, %s761_s2 }
  0x7d   :  { %p589_p1 = pnand %p587_p0, %p584_p13 }
  0x7f   :  { %592 = shalt.err (!%p589_p1)
}
  0x80   :  { %488 = dma.vmem_to_hbm [thread:$0]  %s486_s1, 256, %s761_s2, [#allocation4]  }
  0x81   :  { %s593_s11 = scalar_lea.vmem %s496_s27, 256  ;;  %p598_p3 = scmp.lt.s32.totalorder %s496_s27, %s496_s27 }
  0x82   :  { %p594_p2 = scmp.ne.s32.totalorder %s496_s27, %s593_s11  ;;  %p599_p4 = scmp.lt.s32.totalorder %s593_s11, %s593_s11 }
  0x84   :  { %p600_p5 = por %p599_p4, %p598_p3 }
  0x86   :  { %p601_p6 = pnand %p600_p5, %p594_p2 }
  0x88   :  { %604 = shalt.err (!%p601_p6)
}
  0x89   :  { %s605_s14 = scalar_lea.hbm %s762_s3, 256 }
  0x8a   :  { %p606_p7 = scmp.ne.s32.totalorder %s762_s3, %s605_s14  ;;  %p609_p8 = scmp.lt.u32.totalorder %s605_s14, %s762_s3 }
  0x8c   :  { %p611_p9 = pnand %p609_p8, %p606_p7 }
  0x8e   :  { %614 = shalt.err (!%p611_p9)
}
  0x8f   :  { %498 = dma.vmem_to_hbm [thread:$0]  %s496_s27, 256, %s762_s3, [#allocation7]  }
  0x90   :  { %617 = dma.done.wait [#allocation4], 256  }
  0x91   :  { %618 = vsyncadd [#allocation4], 4294967040 }
  0x92   :  { %619 = dma.done.wait [#allocation7], 256  }
  0x93   :  { %620 = vsyncadd [#allocation7], 4294967040 }
  0x94   :  { %505 = vsyncpa [#allocation3], 1 }
  0x95   :  { %506 = vsyncpa [#allocation4], 1 }
  0x96   :  { %507 = vsyncpa [#allocation7], 1 }

</bundles_post_ra>
